<compile_context>
chip_gen: v7x
topology: tpu7x:2x2x1
jax: 0.10.0
libtpu: 0.0.40
codegen_flags: <defaults>
</compile_context>

<pallas_src>
import functools

import jax
import jax.numpy as jnp
from jax import lax
from jax.experimental import pallas as pl
from jax.experimental.pallas import tpu as pltpu


def _round_up(x, m):
    return ((x + m - 1) // m) * m


def _pick_tile_n(n, c, itemsize, vmem_budget_bytes=16 * 1024 * 1024):
    """Largest row tile whose double-buffered logits fit the VMEM budget (<=512 rows)."""
    max_rows = max(8, vmem_budget_bytes // (2 * max(c, 1) * itemsize))
    tile = min(512, max_rows, _round_up(n, 8))
    return max(8, _round_up(tile, 8))


def _ce_kernel(pred_ref, label_ref, loss_ref, acc_ref, *, n_total):
    # pred_ref:  (TILE_N, C)  native dtype (f32/bf16) logits for this row tile
    # label_ref: (TILE_N, 1)  int32 class indices for this row tile
    # loss_ref:  (1, 1)       f32 output (written on the last grid step)
    # acc_ref:   (1, 1)       f32 running sum of per-sample losses (VMEM scratch)
    i = pl.program_id(0)

    @pl.when(i == 0)
    def _():
        acc_ref[...] = jnp.zeros_like(acc_ref)

    logits = pred_ref[...].astype(jnp.float32)           # (tn, C) cast per-tile in VMEM
    labels = label_ref[...]                              # (tn, 1) int32
    tn, c = logits.shape

    # Numerically stable log-sum-exp along the class (lane) axis.
    m = jnp.max(logits, axis=-1, keepdims=True)                               # (tn, 1)
    lse = m + jnp.log(jnp.sum(jnp.exp(logits - m), axis=-1, keepdims=True))   # (tn, 1)

    # Gather the target-class logit via a one-hot mask (no dynamic gather on the VPU).
    col = lax.broadcasted_iota(jnp.int32, (tn, c), 1)                         # (tn, C)
    onehot = col == labels                                                    # (tn, C)
    target_logit = jnp.sum(jnp.where(onehot, logits, 0.0), axis=-1, keepdims=True)

    per_sample = lse - target_logit                                           # (tn, 1)

    # Mask rows past the true batch size (last tile may be padded).
    row = lax.broadcasted_iota(jnp.int32, (tn, 1), 0) + i * tn
    per_sample = jnp.where(row < n_total, per_sample, 0.0)

    acc_ref[...] += jnp.sum(per_sample, axis=0, keepdims=True)                # (1, 1)

    @pl.when(i == pl.num_programs(0) - 1)
    def _():
        # Mean over the *global* batch size, not the per-tile row count.
        loss_ref[...] = acc_ref[...] * (1.0 / jnp.float32(n_total))


def ce_loss(pred, label, *, tile_n=None):
    """CrossEntropyLoss(pred, label) with mean reduction.

    pred:  (N, C) float32/bfloat16 logits (passed to the kernel in native dtype)
    label: (N,)   integer class indices
    returns: (scalar f32 loss, jnp.array([0.0]))  -- mirrors the PyTorch module.
    """
    n, c = pred.shape
    label2d = label.astype(jnp.int32).reshape(n, 1)

    itemsize = jnp.dtype(pred.dtype).itemsize
    if tile_n is None:
        tile_n = _pick_tile_n(n, c, itemsize)
    tile_n = max(8, min(_round_up(tile_n, 8), _round_up(n, 8)))
    num_tiles = pl.cdiv(n, tile_n)

    # Double-buffered logits tile + label tile + slack; clamp so it is safe on
    # v7x (64 MiB physical VMEM) while still unlocking large tiles on v5e/v6e.
    vmem_need = 2 * tile_n * (c * itemsize + 4) + (1 << 16)
    vmem_limit = int(min(max(3 * vmem_need, 16 << 20), 48 << 20))

    kernel = functools.partial(_ce_kernel, n_total=n)

    loss = pl.pallas_call(
        kernel,
        out_shape=jax.ShapeDtypeStruct((1, 1), jnp.float32),
        grid_spec=pltpu.PrefetchScalarGridSpec(
            num_scalar_prefetch=0,
            grid=(num_tiles,),
            in_specs=[
                pl.BlockSpec((tile_n, c), lambda i: (i, 0)),
                pl.BlockSpec((tile_n, 1), lambda i: (i, 0)),
            ],
            out_specs=pl.BlockSpec((1, 1), lambda i: (0, 0)),
            scratch_shapes=[pltpu.VMEM((1, 1), jnp.float32)],
        ),
        compiler_params=pltpu.CompilerParams(
            dimension_semantics=("arbitrary",),   # reduction axis w/ resident accumulator
            vmem_limit_bytes=vmem_limit,
        ),
    )(pred, label2d)

    return loss[0, 0], jnp.array([0.0], dtype=jnp.float32)


if __name__ == "__main__":
    key = jax.random.PRNGKey(0)
    k1, k2 = jax.random.split(key)

    # Small synthetic batch: N not a multiple of the tile so the padding mask is
    # exercised; C = 128 keeps the class axis lane-dense.
    N, C = 60, 128
    pred = jax.random.normal(k1, (N, C), dtype=jnp.float32)
    label = jax.random.randint(k2, (N,), 0, C, dtype=jnp.int32)

    # Multi-tile path (4 row tiles of 16, last one padded+masked).
    loss, zero = ce_loss(pred, label, tile_n=16)
    jax.block_until_ready((loss, zero))

    ref = jnp.mean(jax.nn.logsumexp(pred, axis=-1) - pred[jnp.arange(N), label])
    assert jnp.allclose(loss, ref, atol=1e-5, rtol=1e-5), (loss, ref)
    assert zero.shape == (1,) and float(zero[0]) == 0.0

    # Auto-tiled path with native-dtype (bf16) logits: no wrapper-side upcast.
    pred_bf16 = pred.astype(jnp.bfloat16)
    loss_bf16, _ = ce_loss(pred_bf16, label)
    jax.block_until_ready(loss_bf16)
    pred_cast = pred_bf16.astype(jnp.float32)
    ref_bf16 = jnp.mean(
        jax.nn.logsumexp(pred_cast, axis=-1) - pred_cast[jnp.arange(N), label]
    )
    assert jnp.allclose(loss_bf16, ref_bf16, atol=1e-4, rtol=1e-4), (loss_bf16, ref_bf16)

    print("KERNEL_OK")
</pallas_src>

<mosaic_0001>
module attributes {stable_mosaic.version = 11 : i64} {
  func.func @_ce_kernel(%arg0: i32, %arg1: memref<16x128xf32, #tpu.memory_space<vmem>>, %arg2: memref<16x1xi32, #tpu.memory_space<vmem>>, %arg3: memref<1x1xf32, #tpu.memory_space<vmem>>, %arg4: memref<1x1xf32, #tpu.memory_space<vmem>>) attributes {dimension_semantics = [#tpu.dimension_semantics<arbitrary>], iteration_bounds = array<i64: 4>, scalar_prefetch = 0 : i64, scratch_operands = 1 : i64, tpu.core_type = #tpu.core_type<tc>, window_params = [{transform_indices = @transform_0, window_bounds = array<i64: 16, 128>}, {transform_indices = @transform_1, window_bounds = array<i64: 16, 1>}, {pipeline_mode = #tpu.pipeline_mode<synchronous>, transform_indices = @transform_2, window_bounds = array<i64: 1, 1>}]} {
    %c0_i32 = arith.constant 0 : i32
    %0 = arith.cmpi eq, %arg0, %c0_i32 : i32
    %1 = arith.extui %0 : i1 to i32
    %c0_i32_0 = arith.constant 0 : i32
    %2 = arith.cmpi ne, %1, %c0_i32_0 : i32
    scf.if %2 {
      %cst_14 = arith.constant 0.000000e+00 : f32
      %38 = vector.broadcast %cst_14 : f32 to vector<1x1xf32>
      %c0_15 = arith.constant 0 : index
      %c0_16 = arith.constant 0 : index
      %39 = vector.load %arg4[%c0_15, %c0_16] : memref<1x1xf32, #tpu.memory_space<vmem>>, vector<1x1xf32>
      tpu.vector_store %arg4[%c0_15, %c0_16], %38 {strides = array<i32>} : memref<1x1xf32, #tpu.memory_space<vmem>>, vector<1x1xf32>,
    } else {
    }
    %c0 = arith.constant 0 : index
    %c0_1 = arith.constant 0 : index
    %3 = vector.load %arg1[%c0, %c0_1] : memref<16x128xf32, #tpu.memory_space<vmem>>, vector<16x128xf32>
    %c0_2 = arith.constant 0 : index
    %c0_3 = arith.constant 0 : index
    %4 = vector.load %arg2[%c0_2, %c0_3] : memref<16x1xi32, #tpu.memory_space<vmem>>, vector<16x1xi32>
    %cst = arith.constant dense<0xFF800000> : vector<16xf32>
    %5 = vector.multi_reduction <maximumf>, %3, %cst [1] : vector<16x128xf32> to vector<16xf32>
    %6 = vector.shape_cast %5 : vector<16xf32> to vector<16x1xf32>
    %7 = vector.broadcast %6 : vector<16x1xf32> to vector<16x128xf32>
    %8 = arith.subf %3, %7 : vector<16x128xf32>
    %9 = math.exp %8 : vector<16x128xf32>
    %cst_4 = arith.constant dense<0.000000e+00> : vector<16xf32>
    %10 = vector.multi_reduction <add>, %9, %cst_4 [1] : vector<16x128xf32> to vector<16xf32>
    %11 = vector.shape_cast %10 : vector<16xf32> to vector<16x1xf32>
    %12 = math.log %11 : vector<16x1xf32>
    %13 = arith.addf %6, %12 : vector<16x1xf32>
    %14 = tpu.iota {dimensions = array<i32: 1>} : vector<16x128xi32>
    %15 = vector.broadcast %4 : vector<16x1xi32> to vector<16x128xi32>
    %16 = arith.cmpi eq, %14, %15 : vector<16x128xi32>
    %cst_5 = arith.constant 0.000000e+00 : f32
    %17 = vector.broadcast %cst_5 : f32 to vector<16x128xf32>
    %18 = arith.select %16, %3, %17 : vector<16x128xi1>, vector<16x128xf32>
    %cst_6 = arith.constant dense<0.000000e+00> : vector<16xf32>
    %19 = vector.multi_reduction <add>, %18, %cst_6 [1] : vector<16x128xf32> to vector<16xf32>
    %20 = vector.shape_cast %19 : vector<16xf32> to vector<16x1xf32>
    %21 = arith.subf %13, %20 : vector<16x1xf32>
    %22 = tpu.iota {dimensions = array<i32: 0>} : vector<16x1xi32>
    %c16_i32 = arith.constant 16 : i32
    %23 = arith.muli %arg0, %c16_i32 : i32
    %24 = vector.broadcast %23 : i32 to vector<16x1xi32>
    %25 = arith.addi %22, %24 : vector<16x1xi32>
    %c60_i32 = arith.constant 60 : i32
    %26 = vector.broadcast %c60_i32 : i32 to vector<16x1xi32>
    %27 = arith.cmpi slt, %25, %26 : vector<16x1xi32>
    %cst_7 = arith.constant 0.000000e+00 : f32
    %28 = vector.broadcast %cst_7 : f32 to vector<16x1xf32>
    %29 = arith.select %27, %21, %28 : vector<16x1xi1>, vector<16x1xf32>
    %c0_8 = arith.constant 0 : index
    %c0_9 = arith.constant 0 : index
    %30 = vector.load %arg4[%c0_8, %c0_9] : memref<1x1xf32, #tpu.memory_space<vmem>>, vector<1x1xf32>
    %cst_10 = arith.constant dense<0.000000e+00> : vector<1xf32>
    %31 = vector.multi_reduction <add>, %29, %cst_10 [0] : vector<16x1xf32> to vector<1xf32>
    %32 = vector.shape_cast %31 : vector<1xf32> to vector<1x1xf32>
    %33 = arith.addf %30, %32 : vector<1x1xf32>
    %c0_11 = arith.constant 0 : index
    %c0_12 = arith.constant 0 : index
    %34 = vector.load %arg4[%c0_11, %c0_12] : memref<1x1xf32, #tpu.memory_space<vmem>>, vector<1x1xf32>
    tpu.vector_store %arg4[%c0_11, %c0_12], %33 {strides = array<i32>} : memref<1x1xf32, #tpu.memory_space<vmem>>, vector<1x1xf32>,
    %c3_i32 = arith.constant 3 : i32
    %35 = arith.cmpi eq, %arg0, %c3_i32 : i32
    %36 = arith.extui %35 : i1 to i32
    %c0_i32_13 = arith.constant 0 : i32
    %37 = arith.cmpi ne, %36, %c0_i32_13 : i32
    scf.if %37 {
      %c0_14 = arith.constant 0 : index
      %c0_15 = arith.constant 0 : index
      %38 = vector.load %arg4[%c0_14, %c0_15] : memref<1x1xf32, #tpu.memory_space<vmem>>, vector<1x1xf32>
      %cst_16 = arith.constant 1.000000e+00 : f32
      %cst_17 = arith.constant 6.000000e+01 : f32
      %39 = arith.divf %cst_16, %cst_17 : f32
      %40 = vector.broadcast %39 : f32 to vector<1x1xf32>
      %41 = arith.mulf %38, %40 : vector<1x1xf32>
      %c0_18 = arith.constant 0 : index
      %c0_19 = arith.constant 0 : index
      %42 = vector.load %arg3[%c0_18, %c0_19] : memref<1x1xf32, #tpu.memory_space<vmem>>, vector<1x1xf32>
      tpu.vector_store %arg3[%c0_18, %c0_19], %41 {strides = array<i32>} : memref<1x1xf32, #tpu.memory_space<vmem>>, vector<1x1xf32>,
    } else {
    }
    return
  }
  func.func @transform_0(%arg0: i32) -> (i32, i32) {
    %c0_i32 = arith.constant 0 : i32
    %c0_i32_0 = arith.constant 0 : i32
    return %arg0, %c0_i32 : i32, i32
  }
  func.func @transform_1(%arg0: i32) -> (i32, i32) {
    %c0_i32 = arith.constant 0 : i32
    %c0_i32_0 = arith.constant 0 : i32
    return %arg0, %c0_i32 : i32, i32
  }
  func.func @transform_2(%arg0: i32) -> (i32, i32) {
    %c0_i32 = arith.constant 0 : i32
    %c0_i32_0 = arith.constant 0 : i32
    %c0_i32_1 = arith.constant 0 : i32
    return %c0_i32, %c0_i32_0 : i32, i32
  }
}

</mosaic_0001>

<bundles_post_ra>
// kernel: tpu_custom_call.1
= control target key start
LH: loop header
LB: loop body
LE: loop exit
PB: predicated region body
PF: predicated region fallthrough
CT: control target
= control target key end

     0   :  { %7 = vsyncpa [#allocation4], 0  ;;  %s387_s9 = smov 0   ;;  %s433_s0 = inlined_call_operand.vmem [shape: f32[60,128], index: 0, kind: input, shape index: {}]   ;;  %s434_s1 = inlined_call_operand.vmem [shape: s32[60,1], index: 1, kind: input, shape index: {}]   ;;  %s435_s2 = inlined_call_operand.hbm [shape: f32[1,1], index: 2, kind: output, shape index: {}]  }
   0x1 LB: > { %s393_s10 = sadd.s32 4294967295, %s367_s9   ;;  %p292_p0 = scmp.ge.s32.totalorder %s367_s9, 1  ;;  %s367_s9 = sphi %s387_s9, %s13_s9  }
   0x2   : > { %p120_p1 = scmp.lt.s32.totalorder %s367_s9, 5 }
   0x4   : > { %p121_p2 = pnand %p292_p0, %p120_p1 }
   0x5   : > { %s293_s11 = sshll.u32 (!%p121_p2), %s393_s10, 1  ;;  %p297_p4 = scmp.ne.s32.totalorder (!%p121_p2), %s393_s10, 0 }
   0x6   : > { %124 = sbr.rel (%p121_p2) target bundleno = 394 (0x18a), region = 28  ;;  %p143_p3 = scmp.lt.s32.totalorder (!%p121_p2), %s293_s11, 7 }
   0xd   : > { %s437_s11 = smov (!%p143_p3, %s293_s11), 7  ;;  %157 = sbr.rel (%p297_p4) target bundleno = 20 (0x14), region = 32 }
   0xe   : > { %s294_s12 = sshll.u32 %s437_s11, 3  ;;  %vm158_vm0 = vcmask (!%p297_p4), 0   ;;  %v369_v0 = vmov (!%p297_p4), 0.0  }
   0xf   : > { %s146_s15 = scalar_lea.vmem %s433_s0, %s294_s12  ;;  %s152_s18 = scalar_lea.vmem %s434_s1, %s294_s12  ;;  %159 = vst.msk [vmem:[#allocation2] sm:$0x1] (!%p297_p4), %vm158_vm0, %v369_v0 }
  0x14 PF: > { %v160_v1 = vld [vmem:[%s146_s15] sm:$0xff]  ;;  %v370_v3 = vmov 0   ;;  %v161_v4 = vld [vmem:[%s146_s15 + $0x8] sm:$0xff]  ;;  %v184_v11 = vlaneseq  ;;  %s298_s19 = sshll.u32 %s393_s10, 4  ;;  %vm222_vm5 = vcmask 0   ;;  %p299_p5 = scmp.ne.s32.totalorder %s393_s10, 3 }
  0x15   : > { %v162_v2 = vld [vmem:[%s152_s18] sm:$0xff]  ;;  %164 = vmax.xlane.f32.xlu0 %v160_v1  ;;  %321 = vset.pattern.permute.xlu1 %v370_v3  ;;  %v163_v5 = vld [vmem:[%s152_s18 + $0x8] sm:$0xff]  ;;  %v206_v26 = vstv %s298_s19 }
  0x16   : > { %187 = vperm.xlu1 %321, %v162_v2   ;;  %322 = vset.pattern.permute.xlu0 %v370_v3  ;;  %v185_v14 = vand.u32 127, %v184_v11  ;;  %v203_v22 = vshrl.u32 %v184_v11, 7  ;;  %v213_v45 = vld [vmem:[#allocation2] sm:$0x1] }
  0x18   : > { %v204_v24 = vadd.s32 8, %v203_v22  ;;  %v207_v30 = vadd.s32 %v206_v26, %v203_v22 }
  0x19   : > { %166 = vmax.xlane.f32.xlu0 %v161_v4 }
  0x1a   : > { %190 = vperm.xlu1 %321, %v163_v5   ;;  %v208_v31 = vadd.s32 %v206_v26, %v204_v24  ;;  %vm209_vm3 = vcmp.lt.s32.totalorder %v207_v30, 60 }
  0x1c   : > { %vm210_vm4 = vcmp.lt.s32.totalorder %v208_v31, 60 }
  0x95   : > { %v188_v13 = vpop.permute.xlu1 %187 }
  0x96   : > { %vm192_vm1 = vcmp.eq.s32.totalorder %v185_v14, %v188_v13 }
  0x97   : > { %v194_v17 = vsel %vm192_vm1, %v160_v1, 0.0 }
  0x99   : > { %v191_v16 = vpop.permute.xlu1 %190 }
  0x9a   : > { %vm193_vm2 = vcmp.eq.s32.totalorder %v185_v14, %v191_v16 }
  0x9b   : > { %v195_v19 = vsel %vm193_vm2, %v161_v4, 0.0 }
  0xa2   : > { %v165_v6 = vpop.xlane.xlu0 %164 }
  0xa3   : > { %v168_v7 = vsub.f32 %v160_v1, %v165_v6 }
  0xa5   : > { %v170_v8 = vmul.f32 1.442695, %v168_v7 }
  0xa6   : > { %v167_v9 = vpop.xlane.xlu0 %166 }
  0xa7   : > { %323 = vpow2.f32 %v170_v8  ;;  %v169_v10 = vsub.f32 %v161_v4, %v167_v9 }
  0xa9   : > { %v172_v12 = vmul.f32 1.442695, %v169_v10 }
  0xab   : > { %325 = vpow2.f32 %v172_v12 }
  0xb1   : > { %v324_v15 = vpop.eup %323 }
  0xb2   : > { %174 = vadd.xlane.f32.xlu0 %v324_v15 }
  0xb5   : > { %v326_v18 = vpop.eup %325 }
  0xb6   : > { %176 = vadd.xlane.f32.xlu1 %v326_v18  ;;  %196 = vadd.xlane.f32.xlu0 %v194_v17 }
  0xba   : > { %198 = vadd.xlane.f32.xlu0 %v195_v19 }
 0x13f   : > { %v175_v20 = vpop.xlane.xlu0 %174 }
 0x140   : > { %327 = vlog2.f32 %v175_v20 }
 0x143   : > { %v177_v21 = vpop.xlane.xlu1 %176  ;;  %v197_v27 = vpop.xlane.xlu0 %196 }
 0x144   : > { %329 = vlog2.f32 %v177_v21 }
 0x147   : > { %v199_v35 = vpop.xlane.xlu0 %198 }
 0x14a   : > { %v328_v23 = vpop.eup %327 }
 0x14b   : > { %v179_v25 = vmul.f32 0.6931472, %v328_v23 }
 0x14d   : > { %v182_v28 = vadd.f32 %v179_v25, %v165_v6 }
 0x14e   : > { %v330_v29 = vpop.eup %329 }
 0x14f   : > { %v181_v32 = vmul.f32 0.6931472, %v330_v29  ;;  %v200_v33 = vsub.f32 %v182_v28, %v197_v27 }
 0x151   : > { %v183_v34 = vadd.f32 %v181_v32, %v167_v9  ;;  %v211_v37 = vsel %vm209_vm3, %v200_v33, 0.0 }
 0x153   : > { %v201_v36 = vsub.f32 %v183_v34, %v199_v35 }
 0x155   : > { %v212_v38 = vsel %vm210_vm4, %v201_v36, 0.0 }
 0x156   : > { %v214_v39 = vadd.f32 %v212_v38, %v211_v37 }
 0x158   : > { %v215_v40 = vrot.slane %v214_v39, 4 }
 0x15a   : > { %v216_v41 = vadd.f32 %v215_v40, %v214_v39 }
 0x15c   : > { %v217_v42 = vrot.slane %v216_v41, 2 }
 0x15e   : > { %v218_v43 = vadd.f32 %v217_v42, %v216_v41 }
 0x160   : > { %v219_v44 = vrot.slane %v218_v43, 1  ;;  %227 = sbr.rel (%p299_p5) target bundleno = 369 (0x171), region = 36 }
 0x162   : > { %v220_v46 = vadd.f32 %v219_v44, %v218_v43 }
 0x164   : > { %v221_v47 = vadd.f32 %v220_v46, %v213_v45 }
 0x166   : > { %223 = vst.msk [vmem:[#allocation2] sm:$0x1] %vm222_vm5, %v221_v47 }
 0x16d   : > { %v228_v48 = vld [vmem:[#allocation2] sm:$0x1] }
 0x16e   : > { %v229_v49 = vmul.f32 0.016666668, %v228_v48 }
 0x170   : > { %230 = vst.msk [vmem:[#allocation3] sm:$0x1] %vm222_vm5, %v229_v49 }
 0x171 PF: > { %p308_p6 = scmp.eq.s32.totalorder %s393_s10, 3  ;;  %s371_s20 = smov [#allocation3]  }
 0x172   : > { %s238_s21 = sshll.u32 %s371_s20, 4  ;;  %s239_s21 = int_to_ptr.vmem [resolvable:$true] %s238_s21 }
 0x173   : > { %s331_s22 = scalar_lea.vmem %s239_s21, 16  ;;  %s337_s23 = scalar_lea.vmem %s239_s21, 32 }
 0x174   : > { %p332_p7 = scmp.ne.s32.totalorder %s239_s21, %s331_s22  ;;  %p338_p10 = scmp.lt.s32.totalorder %s239_s21, %s239_s21 }
 0x175   : > { %p339_p11 = scmp.lt.s32.totalorder %s337_s23, %s331_s22 }
 0x176   : > { %p333_p8 = pnand %p332_p7, %p308_p6 }
 0x177   : > { %p340_p12 = por %p339_p11, %p338_p10 }
 0x178   : > { %p334_p9 = pneg %p333_p8 }
 0x17a   : > { %p341_p13 = pnand %p340_p12, %p334_p9 }
 0x17c   : > { %344 = shalt.err (!%p341_p13)
}
 0x17d   : > { %s345_s26 = scalar_lea.hbm %s435_s2, 16 }
 0x17e   : > { %p346_p0 = scmp.ne.s32.totalorder %s435_s2, %s345_s26  ;;  %p351_p3 = scmp.lt.u32.totalorder %s345_s26, %s435_s2 }
 0x180   : > { %p347_p1 = pnand %p346_p0, %p308_p6 }
 0x182   : > { %p348_p2 = pneg %p347_p1 }
 0x184   : > { %p353_p4 = pnand %p351_p3, %p348_p2 }
 0x186   : > { %356 = shalt.err (!%p353_p4)
}
 0x187   : > { %305 = dma.vmem_to_hbm [thread:$0]  (%p308_p6), %s239_s21, 16, %s435_s2, [#allocation4]  }
 0x188   : > { %362 = dma.done.wait (%p308_p6), [#allocation4], 16  }
 0x189   : > { %364 = vsyncadd (%p308_p6), [#allocation4], 4294967280 }
 0x18a PF: > { %s13_s9 = sadd.s32 1, %s367_s9  }
 0x18b   : > { %p10_p5 = scmp.ge.s32.totalorder %s13_s9, 6  }
 0x18d   :  { %12 = sbr.rel (!%p10_p5) target bundleno = 1 (0x1), region = 66 }
 0x194   :  { %251 = vsyncpa [#allocation4], 1 }
 0x195   :  { %253 = vsyncpa [#allocation4 + $0x1], 1 }

</bundles_post_ra>
